<compile_context>
chip_gen: v7x
topology: tpu7x:2x2x1
jax: 0.10.0
libtpu: 0.0.40
codegen_flags: <defaults>
</compile_context>

<pallas_src>
import jax
import jax.numpy as jnp
from jax.experimental import pallas as pl
from jax.experimental.pallas import tpu as pltpu


LANE = 128  # TPU vreg lane width; matmul N dims are padded to a multiple of this.


def _round_up(n, m):
    return ((n + m - 1) // m) * m


def _pad2(a, rows, cols, dtype):
    r, c = a.shape
    return jnp.pad(a, ((0, rows - r), (0, cols - c))).astype(dtype)


def _sigmoid(x, approx):
    if approx:
        # exp and reciprocal both go to the EUP slot; VPU only does the add.
        return pl.reciprocal(1.0 + jnp.exp(-x), approx=True)
    return jax.nn.sigmoid(x)


def _make_mlp_kernel(approx_act):
    def mlp_kernel(x_ref,
                   w1_ref, b1_ref,
                   w2_ref, b2_ref,
                   w3_ref, b3_ref,
                   w4_ref, b4_ref,
                   o_ref):
        mxu_dtype = w1_ref.dtype          # MXU operand dtype (bf16 or f32)

        x = x_ref[...].astype(mxu_dtype)

        # layer 1: Linear(2*dim-1 -> H) + Sigmoid
        h = jnp.dot(x, w1_ref[...], preferred_element_type=jnp.float32) + b1_ref[...]
        h = _sigmoid(h, approx_act)       # f32 elementwise (v5e-safe)

        # layer 2: Linear(H -> H) + ReLU
        h = jnp.dot(h.astype(mxu_dtype), w2_ref[...],
                    preferred_element_type=jnp.float32) + b2_ref[...]
        h = jnp.maximum(h, 0.0)

        # layer 3: Linear(H -> H) + Sigmoid
        h = jnp.dot(h.astype(mxu_dtype), w3_ref[...],
                    preferred_element_type=jnp.float32) + b3_ref[...]
        h = _sigmoid(h, approx_act)

        # layer 4: Linear(H -> dim); compute is lane-padded (Dp lanes), store
        # narrows to the true output width -> no padded HBM writeback.
        y = jnp.dot(h.astype(mxu_dtype), w4_ref[...],
                    preferred_element_type=jnp.float32) + b4_ref[...]
        o_ref[...] = y[:, :o_ref.shape[1]].astype(o_ref.dtype)

    return mlp_kernel


def _pick_batch_tile(B):
    """Single tile for small batches (grid overhead dominates otherwise); for
    larger batches the biggest ladder tile that still leaves >= 2 grid steps so
    the 'parallel' axis can shard across v7x's two TensorCores.  The tile is
    capped at 4096 so x/out tiles + live activations always fit VMEM; the
    wrapper pads the batch to a tile multiple, so no divisibility is required."""
    if B <= 64:
        return B
    for tile in (4096, 2048, 1024, 512, 256, 128, 64, 32):
        if B > tile:                      # ceil(B / tile) >= 2
            return tile
    return 32


def prepare_params(params, mxu_dtype=jnp.bfloat16):
    """One-time param prep: pad lane dims to multiples of 128 and cast weights
    to the MXU operand dtype.  Padded hidden units evaluate to sigmoid(0)=0.5 /
    relu(0)=0 but only ever multiply zero-padded weight rows of the next layer
    (and padded bias entries are exactly 0), so real outputs are exact."""
    in_f, H = params["w1"].shape
    dim = params["w4"].shape[1]
    Hp = _round_up(H, LANE)
    Dp = _round_up(dim, LANE)

    tensors = (
        _pad2(params["w1"], in_f, Hp, mxu_dtype),
        _pad2(params["b1"][None, :], 1, Hp, jnp.float32),
        _pad2(params["w2"], Hp, Hp, mxu_dtype),
        _pad2(params["b2"][None, :], 1, Hp, jnp.float32),
        _pad2(params["w3"], Hp, Hp, mxu_dtype),
        _pad2(params["b3"][None, :], 1, Hp, jnp.float32),
        _pad2(params["w4"], Hp, Dp, mxu_dtype),
        _pad2(params["b4"][None, :], 1, Dp, jnp.float32),
    )
    return {"tensors": tensors, "in_features": in_f, "dim": dim,
            "approx_act": mxu_dtype != jnp.float32}


def net_nomatrix_forward(x, prepared, *, batch_tile=None, out_dtype=None):
    """x: (B, 2*dim-1).  prepared: output of prepare_params()."""
    w1, b1, w2, b2, w3, b3, w4, b4 = prepared["tensors"]
    in_f = prepared["in_features"]
    dim = prepared["dim"]
    B = x.shape[0]
    out_dtype = x.dtype if out_dtype is None else out_dtype

    bt = batch_tile if batch_tile is not None else _pick_batch_tile(B)
    padded_B = _round_up(B, bt)
    if padded_B != B:
        x = jnp.pad(x, ((0, padded_B - B), (0, 0)))
    grid = (padded_B // bt,)

    def resident(shape):
        # Grid-invariant weights/biases: same block every step (stays in VMEM).
        return pl.BlockSpec(shape, lambda i: (0, 0))

    out = pl.pallas_call(
        _make_mlp_kernel(prepared["approx_act"]),
        out_shape=jax.ShapeDtypeStruct((padded_B, dim), out_dtype),
        grid=grid,
        in_specs=[
            pl.BlockSpec((bt, in_f), lambda i: (i, 0)),       # x tile
            resident(w1.shape), resident(b1.shape),
            resident(w2.shape), resident(b2.shape),
            resident(w3.shape), resident(b3.shape),
            resident(w4.shape), resident(b4.shape),
        ],
        out_specs=pl.BlockSpec((bt, dim), lambda i: (i, 0)),  # unpadded store
        compiler_params=pltpu.CompilerParams(
            dimension_semantics=("parallel",),
            vmem_limit_bytes=32 * 1024 * 1024,
        ),
    )(x, w1, b1, w2, b2, w3, b3, w4, b4)

    return out if padded_B == B else out[:B]


def init_params(key, dim, hidden_nodes):
    """Deterministic init mimicking nn.Linear default U(-1/sqrt(fan_in), +).
    Weights are stored as (in_features, out_features)."""
    in_f = 2 * dim - 1
    sizes = [(in_f, hidden_nodes),
             (hidden_nodes, hidden_nodes),
             (hidden_nodes, hidden_nodes),
             (hidden_nodes, dim)]
    params = {}
    for idx, (fan_in, fan_out) in enumerate(sizes, start=1):
        key, kw, kb = jax.random.split(key, 3)
        bound = 1.0 / jnp.sqrt(jnp.float32(fan_in))
        params[f"w{idx}"] = jax.random.uniform(
            kw, (fan_in, fan_out), jnp.float32, -bound, bound)
        params[f"b{idx}"] = jax.random.uniform(
            kb, (fan_out,), jnp.float32, -bound, bound)
    return params


def reference_forward(x, params):
    hi = jax.lax.Precision.HIGHEST

    def lin(a, w, b):
        return jnp.dot(a, w, precision=hi) + b

    h = jax.nn.sigmoid(lin(x, params["w1"], params["b1"]))
    h = jnp.maximum(lin(h, params["w2"], params["b2"]), 0.0)
    h = jax.nn.sigmoid(lin(h, params["w3"], params["b3"]))
    return lin(h, params["w4"], params["b4"])


if __name__ == "__main__":
    dim = 8                # -> input features = 2*dim - 1 = 15
    hidden_nodes = 50      # module default
    batch = 16

    key = jax.random.PRNGKey(0)
    key, kx = jax.random.split(key)
    params = init_params(key, dim, hidden_nodes)
    x = jax.random.normal(kx, (batch, 2 * dim - 1), jnp.float32)

    ref = reference_forward(x, params)

    # f32 MXU path: exact sigmoid, strict match against the pure-JAX reference.
    prep_f32 = prepare_params(params, mxu_dtype=jnp.float32)
    out_f32 = jax.block_until_ready(net_nomatrix_forward(x, prep_f32))
    assert out_f32.shape == (batch, dim)
    assert jnp.allclose(out_f32, ref, atol=1e-4, rtol=1e-4)

    # bf16 MXU path (default; v5e/v6e/v7x fast path): bf16 operands, f32 acc,
    # EUP-approx sigmoid.
    prep_bf16 = prepare_params(params, mxu_dtype=jnp.bfloat16)
    out_bf16 = jax.block_until_ready(net_nomatrix_forward(x, prep_bf16))
    assert out_bf16.shape == (batch, dim)
    assert jnp.allclose(out_bf16, ref, atol=5e-2, rtol=5e-2)

    print("KERNEL_OK")
</pallas_src>

<mosaic_0001>
module attributes {stable_mosaic.version = 11 : i64} {
  func.func @mlp_kernel(%arg0: i32, %arg1: memref<16x15xf32, #tpu.memory_space<vmem>>, %arg2: memref<15x128xf32, #tpu.memory_space<vmem>>, %arg3: memref<1x128xf32, #tpu.memory_space<vmem>>, %arg4: memref<128x128xf32, #tpu.memory_space<vmem>>, %arg5: memref<1x128xf32, #tpu.memory_space<vmem>>, %arg6: memref<128x128xf32, #tpu.memory_space<vmem>>, %arg7: memref<1x128xf32, #tpu.memory_space<vmem>>, %arg8: memref<128x128xf32, #tpu.memory_space<vmem>>, %arg9: memref<1x128xf32, #tpu.memory_space<vmem>>, %arg10: memref<16x8xf32, #tpu.memory_space<vmem>>) attributes {dimension_semantics = [#tpu.dimension_semantics<parallel>], iteration_bounds = array<i64: 1>, scalar_prefetch = 0 : i64, scratch_operands = 0 : i64, tpu.core_type = #tpu.core_type<tc>, window_params = [{transform_indices = @transform_0, window_bounds = array<i64: 16, 15>}, {pipeline_mode = #tpu.pipeline_mode<synchronous>, transform_indices = @transform_1, window_bounds = array<i64: 15, 128>}, {pipeline_mode = #tpu.pipeline_mode<synchronous>, transform_indices = @transform_2, window_bounds = array<i64: 1, 128>}, {pipeline_mode = #tpu.pipeline_mode<synchronous>, transform_indices = @transform_3, window_bounds = array<i64: 128, 128>}, {pipeline_mode = #tpu.pipeline_mode<synchronous>, transform_indices = @transform_4, window_bounds = array<i64: 1, 128>}, {pipeline_mode = #tpu.pipeline_mode<synchronous>, transform_indices = @transform_5, window_bounds = array<i64: 128, 128>}, {pipeline_mode = #tpu.pipeline_mode<synchronous>, transform_indices = @transform_6, window_bounds = array<i64: 1, 128>}, {pipeline_mode = #tpu.pipeline_mode<synchronous>, transform_indices = @transform_7, window_bounds = array<i64: 128, 128>}, {pipeline_mode = #tpu.pipeline_mode<synchronous>, transform_indices = @transform_8, window_bounds = array<i64: 1, 128>}, {transform_indices = @transform_9, window_bounds = array<i64: 16, 8>}]} {
    %c0 = arith.constant 0 : index
    %c0_0 = arith.constant 0 : index
    %0 = vector.load %arg1[%c0, %c0_0] : memref<16x15xf32, #tpu.memory_space<vmem>>, vector<16x15xf32>
    %c0_1 = arith.constant 0 : index
    %c0_2 = arith.constant 0 : index
    %1 = vector.load %arg2[%c0_1, %c0_2] : memref<15x128xf32, #tpu.memory_space<vmem>>, vector<15x128xf32>
    %cst = arith.constant dense<0.000000e+00> : vector<16x128xf32>
    %2 = tpu.matmul %0, %1, %cst {dimension_numbers = #tpu.dot_dimension_numbers<[1], [0], [0], [1], [0, 0, 1, 1], [], []>} : vector<16x15xf32>, vector<15x128xf32>, vector<16x128xf32> -> vector<16x128xf32>
    %c0_3 = arith.constant 0 : index
    %c0_4 = arith.constant 0 : index
    %3 = vector.load %arg3[%c0_3, %c0_4] : memref<1x128xf32, #tpu.memory_space<vmem>>, vector<1x128xf32>
    %4 = vector.broadcast %3 : vector<1x128xf32> to vector<16x128xf32>
    %5 = arith.addf %2, %4 : vector<16x128xf32>
    %6 = arith.negf %5 : vector<16x128xf32>
    %7 = math.exp %6 : vector<16x128xf32>
    %cst_5 = arith.constant 1.000000e+00 : f32
    %8 = vector.broadcast %cst_5 : f32 to vector<16x128xf32>
    %9 = arith.addf %8, %7 : vector<16x128xf32>
    %10 = arith.divf %8, %9 : vector<16x128xf32>
    %c0_6 = arith.constant 0 : index
    %c0_7 = arith.constant 0 : index
    %11 = vector.load %arg4[%c0_6, %c0_7] : memref<128x128xf32, #tpu.memory_space<vmem>>, vector<128x128xf32>
    %cst_8 = arith.constant dense<0.000000e+00> : vector<16x128xf32>
    %12 = tpu.matmul %10, %11, %cst_8 {dimension_numbers = #tpu.dot_dimension_numbers<[1], [0], [0], [1], [0, 0, 1, 1], [], []>} : vector<16x128xf32>, vector<128x128xf32>, vector<16x128xf32> -> vector<16x128xf32>
    %c0_9 = arith.constant 0 : index
    %c0_10 = arith.constant 0 : index
    %13 = vector.load %arg5[%c0_9, %c0_10] : memref<1x128xf32, #tpu.memory_space<vmem>>, vector<1x128xf32>
    %14 = vector.broadcast %13 : vector<1x128xf32> to vector<16x128xf32>
    %15 = arith.addf %12, %14 : vector<16x128xf32>
    %cst_11 = arith.constant 0.000000e+00 : f32
    %16 = vector.broadcast %cst_11 : f32 to vector<16x128xf32>
    %17 = arith.maximumf %15, %16 : vector<16x128xf32>
    %c0_12 = arith.constant 0 : index
    %c0_13 = arith.constant 0 : index
    %18 = vector.load %arg6[%c0_12, %c0_13] : memref<128x128xf32, #tpu.memory_space<vmem>>, vector<128x128xf32>
    %cst_14 = arith.constant dense<0.000000e+00> : vector<16x128xf32>
    %19 = tpu.matmul %17, %18, %cst_14 {dimension_numbers = #tpu.dot_dimension_numbers<[1], [0], [0], [1], [0, 0, 1, 1], [], []>} : vector<16x128xf32>, vector<128x128xf32>, vector<16x128xf32> -> vector<16x128xf32>
    %c0_15 = arith.constant 0 : index
    %c0_16 = arith.constant 0 : index
    %20 = vector.load %arg7[%c0_15, %c0_16] : memref<1x128xf32, #tpu.memory_space<vmem>>, vector<1x128xf32>
    %21 = vector.broadcast %20 : vector<1x128xf32> to vector<16x128xf32>
    %22 = arith.addf %19, %21 : vector<16x128xf32>
    %23 = arith.negf %22 : vector<16x128xf32>
    %24 = math.exp %23 : vector<16x128xf32>
    %cst_17 = arith.constant 1.000000e+00 : f32
    %25 = vector.broadcast %cst_17 : f32 to vector<16x128xf32>
    %26 = arith.addf %25, %24 : vector<16x128xf32>
    %27 = arith.divf %25, %26 : vector<16x128xf32>
    %c0_18 = arith.constant 0 : index
    %c0_19 = arith.constant 0 : index
    %28 = vector.load %arg8[%c0_18, %c0_19] : memref<128x128xf32, #tpu.memory_space<vmem>>, vector<128x128xf32>
    %cst_20 = arith.constant dense<0.000000e+00> : vector<16x128xf32>
    %29 = tpu.matmul %27, %28, %cst_20 {dimension_numbers = #tpu.dot_dimension_numbers<[1], [0], [0], [1], [0, 0, 1, 1], [], []>} : vector<16x128xf32>, vector<128x128xf32>, vector<16x128xf32> -> vector<16x128xf32>
    %c0_21 = arith.constant 0 : index
    %c0_22 = arith.constant 0 : index
    %30 = vector.load %arg9[%c0_21, %c0_22] : memref<1x128xf32, #tpu.memory_space<vmem>>, vector<1x128xf32>
    %31 = vector.broadcast %30 : vector<1x128xf32> to vector<16x128xf32>
    %32 = arith.addf %29, %31 : vector<16x128xf32>
    %33 = vector.extract_strided_slice %32 {offsets = [0, 0], sizes = [16, 8], strides = [1, 1]} : vector<16x128xf32> to vector<16x8xf32>
    %c0_23 = arith.constant 0 : index
    %c0_24 = arith.constant 0 : index
    %34 = vector.load %arg10[%c0_23, %c0_24] : memref<16x8xf32, #tpu.memory_space<vmem>>, vector<16x8xf32>
    tpu.vector_store %arg10[%c0_23, %c0_24], %33 {strides = array<i32>} : memref<16x8xf32, #tpu.memory_space<vmem>>, vector<16x8xf32>,
    return
  }
  func.func @transform_0(%arg0: i32) -> (i32, i32) {
    %c0_i32 = arith.constant 0 : i32
    %c0_i32_0 = arith.constant 0 : i32
    return %arg0, %c0_i32 : i32, i32
  }
  func.func @transform_1(%arg0: i32) -> (i32, i32) {
    %c0_i32 = arith.constant 0 : i32
    %c0_i32_0 = arith.constant 0 : i32
    %c0_i32_1 = arith.constant 0 : i32
    return %c0_i32, %c0_i32_0 : i32, i32
  }
  func.func @transform_2(%arg0: i32) -> (i32, i32) {
    %c0_i32 = arith.constant 0 : i32
    %c0_i32_0 = arith.constant 0 : i32
    %c0_i32_1 = arith.constant 0 : i32
    return %c0_i32, %c0_i32_0 : i32, i32
  }
  func.func @transform_3(%arg0: i32) -> (i32, i32) {
    %c0_i32 = arith.constant 0 : i32
    %c0_i32_0 = arith.constant 0 : i32
    %c0_i32_1 = arith.constant 0 : i32
    return %c0_i32, %c0_i32_0 : i32, i32
  }
  func.func @transform_4(%arg0: i32) -> (i32, i32) {
    %c0_i32 = arith.constant 0 : i32
    %c0_i32_0 = arith.constant 0 : i32
    %c0_i32_1 = arith.constant 0 : i32
    return %c0_i32, %c0_i32_0 : i32, i32
  }
  func.func @transform_5(%arg0: i32) -> (i32, i32) {
    %c0_i32 = arith.constant 0 : i32
    %c0_i32_0 = arith.constant 0 : i32
    %c0_i32_1 = arith.constant 0 : i32
    return %c0_i32, %c0_i32_0 : i32, i32
  }
  func.func @transform_6(%arg0: i32) -> (i32, i32) {
    %c0_i32 = arith.constant 0 : i32
    %c0_i32_0 = arith.constant 0 : i32
    %c0_i32_1 = arith.constant 0 : i32
    return %c0_i32, %c0_i32_0 : i32, i32
  }
  func.func @transform_7(%arg0: i32) -> (i32, i32) {
    %c0_i32 = arith.constant 0 : i32
    %c0_i32_0 = arith.constant 0 : i32
    %c0_i32_1 = arith.constant 0 : i32
    return %c0_i32, %c0_i32_0 : i32, i32
  }
  func.func @transform_8(%arg0: i32) -> (i32, i32) {
    %c0_i32 = arith.constant 0 : i32
    %c0_i32_0 = arith.constant 0 : i32
    %c0_i32_1 = arith.constant 0 : i32
    return %c0_i32, %c0_i32_0 : i32, i32
  }
  func.func @transform_9(%arg0: i32) -> (i32, i32) {
    %c0_i32 = arith.constant 0 : i32
    %c0_i32_0 = arith.constant 0 : i32
    return %arg0, %c0_i32 : i32, i32
  }
}

</mosaic_0001>

<bundles_post_ra>
// kernel: tpu_custom_call.1
= control target key start
LH: loop header
LB: loop body
LE: loop exit
PB: predicated region body
PF: predicated region fallthrough
CT: control target
= control target key end

     0   :  { %14 = vsyncpa [#allocation3], 0  ;;  %s1117_s0 = inlined_call_operand.hbm [shape: f32[16,15], index: 0, kind: input, shape index: {}]   ;;  %s1118_s1 = inlined_call_operand.hbm [shape: f32[15,128], index: 1, kind: input, shape index: {}]   ;;  %s1119_s2 = inlined_call_operand.vmem [shape: f32[1,128], index: 2, kind: input, shape index: {}]   ;;  %s1120_s3 = inlined_call_operand.hbm [shape: f32[128,128], index: 3, kind: input, shape index: {}]   ;;  %s1121_s4 = inlined_call_operand.vmem [shape: f32[1,128], index: 4, kind: input, shape index: {}]   ;;  %s1122_s5 = inlined_call_operand.hbm [shape: f32[128,128], index: 5, kind: input, shape index: {}]   ;;  %s1123_s6 = inlined_call_operand.vmem [shape: f32[1,128], index: 6, kind: input, shape index: {}]   ;;  %s1124_s7 = inlined_call_operand.hbm [shape: f32[128,128], index: 7, kind: input, shape index: {}]   ;;  %s1125_s8 = inlined_call_operand.vmem [shape: f32[1,128], index: 8, kind: input, shape index: {}]   ;;  %s1126_s9 = inlined_call_operand.vmem [shape: f32[16,8], index: 9, kind: output, shape index: {}]  }
   0x1   :  { %15 = vsyncpa [#allocation5], 0 }
   0x2   :  { %16 = vsyncpa [#allocation8], 0  ;;  %s950_s30 = smov [#allocation4]   ;;  %s951_s11 = smov [#allocation7]  }
   0x3   :  { %s34_s10 = sshll.u32 %s950_s30, 4  ;;  %s62_s12 = sshll.u32 %s951_s11, 4  ;;  %s35_s10 = int_to_ptr.vmem [resolvable:$true] %s34_s10  ;;  %s1008_s12 = int_to_ptr.vmem [resolvable:$true] %s62_s12 }
   0x4   :  { %s834_s15 = scalar_lea.hbm %s1118_s1, 256 }
   0x5   :  { %p835_p0 = scmp.ne.s32.totalorder %s1118_s1, %s834_s15  ;;  %p838_p1 = scmp.lt.u32.totalorder %s834_s15, %s1118_s1 }
   0x7   :  { %p840_p2 = pnand %p838_p1, %p835_p0 }
   0x9   :  { %843 = shalt.err (!%p840_p2)
}
   0xa   :  { %s844_s20 = scalar_lea.vmem %s35_s10, 256  ;;  %p849_p4 = scmp.lt.s32.totalorder %s35_s10, %s35_s10 }
   0xb   :  { %p845_p3 = scmp.ne.s32.totalorder %s35_s10, %s844_s20  ;;  %p850_p5 = scmp.lt.s32.totalorder %s844_s20, %s844_s20 }
   0xd   :  { %p851_p6 = por %p850_p5, %p849_p4 }
   0xf   :  { %p852_p7 = pnand %p851_p6, %p845_p3 }
  0x11   :  { %855 = shalt.err (!%p852_p7)
}
  0x12   :  { %s952_s21 = smov 128   ;;  %s953_s22 = smov 8  }
  0x13   :  { %40 = dma.hbm_to_vmem [thread:$0]  %s1118_s1, 256, %s35_s10, [#allocation5], %s952_s21, %s952_s21, %s953_s22  }
  0x14   :  { %s856_s27 = scalar_lea.hbm %s1122_s5, 2048 }
  0x15   :  { %p857_p8 = scmp.ne.s32.totalorder %s1122_s5, %s856_s27  ;;  %p860_p9 = scmp.lt.u32.totalorder %s856_s27, %s1122_s5 }
  0x17   :  { %p862_p10 = pnand %p860_p9, %p857_p8 }
  0x19   :  { %865 = shalt.err (!%p862_p10)
}
  0x1a   :  { %s866_s13 = scalar_lea.vmem %s1008_s12, 2048  ;;  %p871_p12 = scmp.lt.s32.totalorder %s1008_s12, %s1008_s12 }
  0x1b   :  { %p867_p11 = scmp.ne.s32.totalorder %s1008_s12, %s866_s13  ;;  %p872_p13 = scmp.lt.s32.totalorder %s866_s13, %s866_s13 }
  0x1d   :  { %p873_p0 = por %p872_p13, %p871_p12 }
  0x1f   :  { %p874_p1 = pnand %p873_p0, %p867_p11 }
  0x21   :  { %877 = shalt.err (!%p874_p1)
}
  0x22   :  { %68 = dma.hbm_to_vmem [thread:$0]  %s1122_s5, 2048, %s1008_s12, [#allocation8], %s952_s21, %s952_s21, %s953_s22  }
  0x23   :  { %s954_s14 = smov [#allocation2]   ;;  %s955_s16 = smov [#allocation6]  }
  0x24   :  { %s22_s15 = sshll.u32 %s954_s14, 4  ;;  %s48_s17 = sshll.u32 %s955_s16, 4  ;;  %s23_s15 = int_to_ptr.vmem [resolvable:$true] %s22_s15  ;;  %s1045_s17 = int_to_ptr.vmem [resolvable:$true] %s48_s17 }
  0x25   :  { %s878_s20 = scalar_lea.hbm %s1117_s0, 256 }
  0x26   :  { %p879_p2 = scmp.ne.s32.totalorder %s1117_s0, %s878_s20  ;;  %p882_p3 = scmp.lt.u32.totalorder %s878_s20, %s1117_s0 }
  0x28   :  { %p884_p4 = pnand %p882_p3, %p879_p2 }
  0x2a   :  { %887 = shalt.err (!%p884_p4)
}
  0x2b   :  { %s888_s5 = scalar_lea.vmem %s23_s15, 256  ;;  %p893_p6 = scmp.lt.s32.totalorder %s23_s15, %s23_s15 }
  0x2c   :  { %p889_p5 = scmp.ne.s32.totalorder %s23_s15, %s888_s5  ;;  %p894_p7 = scmp.lt.s32.totalorder %s888_s5, %s888_s5 }
  0x2e   :  { %p895_p8 = por %p894_p7, %p893_p6 }
  0x30   :  { %p896_p9 = pnand %p895_p8, %p889_p5 }
  0x32   :  { %899 = shalt.err (!%p896_p9)
}
  0x33   :  { %28 = dma.hbm_to_vmem [thread:$0]  %s1117_s0, 256, %s23_s15, [#allocation3], %s952_s21, %s952_s21, %s953_s22  }
  0x34   :  { %s900_s30 = scalar_lea.hbm %s1120_s3, 2048 }
  0x35   :  { %p901_p10 = scmp.ne.s32.totalorder %s1120_s3, %s900_s30  ;;  %p904_p11 = scmp.lt.u32.totalorder %s900_s30, %s1120_s3 }
  0x37   :  { %p906_p12 = pnand %p904_p11, %p901_p10 }
  0x39   :  { %909 = shalt.err (!%p906_p12)
}
  0x3a   :  { %s910_s14 = scalar_lea.vmem %s1045_s17, 2048  ;;  %p915_p0 = scmp.lt.s32.totalorder %s1045_s17, %s1045_s17 }
  0x3b   :  { %p911_p13 = scmp.ne.s32.totalorder %s1045_s17, %s910_s14  ;;  %p916_p1 = scmp.lt.s32.totalorder %s910_s14, %s910_s14 }
  0x3d   :  { %p917_p2 = por %p916_p1, %p915_p0 }
  0x3f   :  { %p918_p3 = pnand %p917_p2, %p911_p13 }
  0x41   :  { %921 = shalt.err (!%p918_p3)
}
  0x42   :  { %54 = dma.hbm_to_vmem [thread:$0]  %s1120_s3, 2048, %s1045_s17, [#allocation5], %s952_s21, %s952_s21, %s953_s22  }
  0x43   :  { %s956_s16 = smov [#allocation9]   ;;  %s922_s23 = scalar_lea.hbm %s1124_s7, 2048 }
  0x44   :  { %s76_s18 = sshll.u32 %s956_s16, 4  ;;  %p923_p4 = scmp.ne.s32.totalorder %s1124_s7, %s922_s23  ;;  %s77_s18 = int_to_ptr.vmem [resolvable:$true] %s76_s18 }
  0x45   :  { %p926_p5 = scmp.lt.u32.totalorder %s922_s23, %s1124_s7 }
  0x47   :  { %p928_p6 = pnand %p926_p5, %p923_p4 }
  0x49   :  { %931 = shalt.err (!%p928_p6)
}
  0x4a   :  { %s932_s12 = scalar_lea.vmem %s77_s18, 2048  ;;  %p937_p8 = scmp.lt.s32.totalorder %s77_s18, %s77_s18 }
  0x4b   :  { %p933_p7 = scmp.ne.s32.totalorder %s77_s18, %s932_s12  ;;  %p938_p9 = scmp.lt.s32.totalorder %s932_s12, %s932_s12 }
  0x4d   :  { %p939_p10 = por %p938_p9, %p937_p8 }
  0x4f   :  { %p940_p11 = pnand %p939_p10, %p933_p7 }
  0x51   :  { %943 = shalt.err (!%p940_p11)
}
  0x52   :  { %82 = dma.hbm_to_vmem [thread:$0]  %s1124_s7, 2048, %s77_s18, [#allocation8], %s952_s21, %s952_s21, %s953_s22  }
  0x53   :  { %944 = dma.done.wait [#allocation3], 256  }
  0x54   :  { %945 = vsyncadd [#allocation3], 4294967040 }
  0x55   :  { %946 = dma.done.wait [#allocation5], 2304  }
  0x56   :  { %947 = vsyncadd [#allocation5], 4294964992 }
  0x57   :  { %948 = dma.done.wait [#allocation8], 4096  }
  0x58   :  { %949 = vsyncadd [#allocation8], 4294963200  ;;  %vm118_vm0 = vcmask 1046528   ;;  %vm111_vm1 = vcmask 121856   ;;  %vm957_vm2 = vmmov 1   ;;  %v102_v0 = vld [vmem:[#allocation4] sm:$0xff] }
  0x59   :  { %vm709_vm3 = vmpackc.low %vm118_vm0, %vm957_vm2  ;;  %v103_v1 = vld [vmem:[#allocation4 + $0x8] sm:$0x7f]  ;;  %v100_v2 = vld [vmem:[#allocation2] sm:$0xff]  ;;  %vm517_vm4 = vcmask 64512  }
  0x5a   :  { %v708_v3 = vpack.c.bf16 %v103_v1, %v102_v0  ;;  %600 = vmatprep.mubr.msk.f32.mxu0 %vm111_vm1, %v100_v2  ;;  %v209_v4 = vld [vmem:[#allocation6] sm:$0xff]  ;;  %v210_v5 = vld [vmem:[#allocation6 + $0x8] sm:$0xff]  ;;  %v211_v8 = vld [vmem:[#allocation6 + $0x10] sm:$0xff] }
  0x5b   :  { %v714_v6 = vpack.c.bf16 %v210_v5, %v209_v4  ;;  %v101_v7 = vld [vmem:[#allocation2 + $0x8] sm:$0xff]  ;;  %v212_v9 = vld [vmem:[#allocation6 + $0x18] sm:$0xff]  ;;  %v213_v11 = vld [vmem:[#allocation6 + $0x20] sm:$0xff] }
  0x5c   :  { %710 = vmatprep.subr.msk.bf16.mxu0 %vm709_vm3, %v708_v3  ;;  %v718_v10 = vpack.c.bf16 %v212_v9, %v211_v8  ;;  %v214_v12 = vld [vmem:[#allocation6 + $0x28] sm:$0xff]  ;;  %v215_v14 = vld [vmem:[#allocation6 + $0x30] sm:$0xff]  ;;  %v216_v15 = vld [vmem:[#allocation6 + $0x38] sm:$0xff] }
  0x5d   :  { %713 = vmatpush3.bf16.msk.msra.mxu0 %vm709_vm3, %v708_v3  ;;  %715 = vmatprep.subr.bf16.mxu1 %v714_v6  ;;  %v722_v13 = vpack.c.bf16 %v214_v12, %v213_v11  ;;  %v726_v16 = vpack.c.bf16 %v216_v15, %v215_v14  ;;  %v217_v17 = vld [vmem:[#allocation6 + $0x40] sm:$0xff]  ;;  %v218_v18 = vld [vmem:[#allocation6 + $0x48] sm:$0xff]  ;;  %v219_v20 = vld [vmem:[#allocation6 + $0x50] sm:$0xff] }
  0x5e   :  { %717 = vmatpush3.bf16.msra.mxu1 %v714_v6  ;;  %v730_v19 = vpack.c.bf16 %v218_v18, %v217_v17  ;;  %v220_v21 = vld [vmem:[#allocation6 + $0x58] sm:$0xff]  ;;  %v221_v23 = vld [vmem:[#allocation6 + $0x60] sm:$0xff]  ;;  %v222_v24 = vld [vmem:[#allocation6 + $0x68] sm:$0xff] }
  0x5f   :  { %719 = vmatprep.subr.bf16.mxu1 %v718_v10  ;;  %v734_v22 = vpack.c.bf16 %v220_v21, %v219_v20  ;;  %v223_v25 = vld [vmem:[#allocation6 + $0x70] sm:$0xff]  ;;  %v738_v26 = vpack.c.bf16 %v222_v24, %v221_v23  ;;  %v224_v27 = vld [vmem:[#allocation6 + $0x78] sm:$0xff]  ;;  %v309_v29 = vld [vmem:[#allocation7] sm:$0xff] }
  0x60   :  { %601 = vmatmul.mubr.msk.f32.vlgmr.msra.gmra.mrb[0].mxu0 %vm111_vm1, %v101_v7  ;;  %v742_v28 = vpack.c.bf16 %v224_v27, %v223_v25  ;;  %v310_v30 = vld [vmem:[#allocation7 + $0x8] sm:$0xff]  ;;  %v311_v31 = vld [vmem:[#allocation7 + $0x10] sm:$0xff]  ;;  %v312_v33 = vld [vmem:[#allocation7 + $0x18] sm:$0xff] }
  0x61   :  { %v746_v32 = vpack.c.bf16 %v310_v30, %v309_v29  ;;  %v750_v34 = vpack.c.bf16 %v312_v33, %v311_v31  ;;  %v313_v35 = vld [vmem:[#allocation7 + $0x20] sm:$0xff]  ;;  %v314_v36 = vld [vmem:[#allocation7 + $0x28] sm:$0xff]  ;;  %v315_v38 = vld [vmem:[#allocation7 + $0x30] sm:$0xff] }
  0x62   :  { %721 = vmatpush3.bf16.msra.mxu1 %v718_v10  ;;  %v754_v37 = vpack.c.bf16 %v314_v36, %v313_v35  ;;  %v316_v39 = vld [vmem:[#allocation7 + $0x38] sm:$0xff]  ;;  %v317_v41 = vld [vmem:[#allocation7 + $0x40] sm:$0xff]  ;;  %v318_v42 = vld [vmem:[#allocation7 + $0x48] sm:$0xff] }
  0x63   :  { %723 = vmatprep.subr.bf16.mxu1 %v722_v13  ;;  %747 = vmatprep.subr.bf16.mxu0 %v746_v32  ;;  %v758_v40 = vpack.c.bf16 %v316_v39, %v315_v38  ;;  %v762_v43 = vpack.c.bf16 %v318_v42, %v317_v41  ;;  %v319_v44 = vld [vmem:[#allocation7 + $0x50] sm:$0xff]  ;;  %v320_v45 = vld [vmem:[#allocation7 + $0x58] sm:$0xff]  ;;  %v321_v47 = vld [vmem:[#allocation7 + $0x60] sm:$0xff] }
  0x64   :  { %749 = vmatpush3.bf16.msra.mxu0 %v746_v32  ;;  %v766_v46 = vpack.c.bf16 %v320_v45, %v319_v44  ;;  %v322_v48 = vld [vmem:[#allocation7 + $0x68] sm:$0xff]  ;;  %v527_v50 = vld [vmem:[%s1119_s2] ss:$0 sm:$0xff]  ;;  %v324_v0 = vld [vmem:[#allocation7 + $0x78] sm:$0xff] }
  0x65   :  { %751 = vmatprep.subr.bf16.mxu0 %v750_v34  ;;  %v770_v49 = vpack.c.bf16 %v322_v48, %v321_v47  ;;  %v323_v63 = vld [vmem:[#allocation7 + $0x70] sm:$0xff]  ;;  %v419_v2 = vld [vmem:[#allocation9] sm:$0xff]  ;;  %v420_v3 = vld [vmem:[#allocation9 + $0x8] sm:$0xff] }
  0x66   :  { %725 = vmatpush3.bf16.msra.mxu1 %v722_v13  ;;  %v774_v1 = vpack.c.bf16 %v324_v0, %v323_v63  ;;  %v778_v4 = vpack.c.bf16 %v420_v3, %v419_v2  ;;  %v533_v5 = vld [vmem:[%s1121_s4] ss:$0 sm:$0xff]  ;;  %v422_v13 = vld [vmem:[#allocation9 + $0x18] sm:$0xff]  ;;  %v423_v15 = vld [vmem:[#allocation9 + $0x20] sm:$0xff] }
  0x67   :  { %727 = vmatprep.subr.bf16.mxu1 %v726_v16  ;;  %v421_v12 = vld [vmem:[#allocation9 + $0x10] sm:$0xff]  ;;  %v427_v21 = vld [vmem:[#allocation9 + $0x40] sm:$0xff]  ;;  %v430_v25 = vld [vmem:[#allocation9 + $0x58] sm:$0xff] }
  0x68   :  { %753 = vmatpush3.bf16.msra.mxu0 %v750_v34  ;;  %v782_v14 = vpack.c.bf16 %v422_v13, %v421_v12  ;;  %v425_v18 = vld [vmem:[#allocation9 + $0x30] sm:$0xff]  ;;  %v431_v27 = vld [vmem:[#allocation9 + $0x60] sm:$0xff]  ;;  %v434_v31 = vld [vmem:[#allocation9 + $0x78] sm:$0xff] }
  0x69   :  { %755 = vmatprep.subr.bf16.mxu0 %v754_v37  ;;  %v429_v24 = vld [vmem:[#allocation9 + $0x50] sm:$0xff] }
  0x6a   :  { %729 = vmatpush3.bf16.msra.mxu1 %v726_v16  ;;  %v424_v16 = vld [vmem:[#allocation9 + $0x28] sm:$0xff]  ;;  %v433_v29 = vld [vmem:[#allocation9 + $0x70] sm:$0xff] }
  0x6b   :  { %731 = vmatprep.subr.bf16.mxu1 %v730_v19  ;;  %v786_v17 = vpack.c.bf16 %v424_v16, %v423_v15  ;;  %v806_v32 = vpack.c.bf16 %v434_v31, %v433_v29  ;;  %v534_v33 = vld [vmem:[%s1123_s6] ss:$0 sm:$0xff] }
  0x6c   :  { %757 = vmatpush3.bf16.msra.mxu0 %v754_v37 }
  0x6d   :  { %759 = vmatprep.subr.bf16.mxu0 %v758_v40 }
  0x6e   :  { %733 = vmatpush3.bf16.msra.mxu1 %v730_v19  ;;  %v426_v19 = vld [vmem:[#allocation9 + $0x38] sm:$0xff] }
  0x6f   :  { %735 = vmatprep.subr.bf16.mxu1 %v734_v22  ;;  %v790_v20 = vpack.c.bf16 %v426_v19, %v425_v18 }
  0x70   :  { %761 = vmatpush3.bf16.msra.mxu0 %v758_v40 }
  0x71   :  { %763 = vmatprep.subr.bf16.mxu0 %v762_v43 }
  0x72   :  { %737 = vmatpush3.bf16.msra.mxu1 %v734_v22  ;;  %v428_v22 = vld [vmem:[#allocation9 + $0x48] sm:$0xff] }
  0x73   :  { %739 = vmatprep.subr.bf16.mxu1 %v738_v26  ;;  %v794_v23 = vpack.c.bf16 %v428_v22, %v427_v21 }
  0x74   :  { %765 = vmatpush3.bf16.msra.mxu0 %v762_v43 }
  0x75   :  { %767 = vmatprep.subr.bf16.mxu0 %v766_v46 }
  0x76   :  { %741 = vmatpush3.bf16.msra.mxu1 %v738_v26  ;;  %v798_v26 = vpack.c.bf16 %v430_v25, %v429_v24 }
  0x77   :  { %743 = vmatprep.subr.bf16.mxu1 %v742_v28 }
  0x78   :  { %769 = vmatpush3.bf16.msra.mxu0 %v766_v46  ;;  %v537_v46 = vld [vmem:[%s1125_s8] ss:$0 sm:$0xff] }
  0x79   :  { %771 = vmatprep.subr.bf16.mxu0 %v770_v49 }
  0x7a   :  { %745 = vmatpush3.bf16.msra.mxu1 %v742_v28  ;;  %v432_v28 = vld [vmem:[#allocation9 + $0x68] sm:$0xff] }
  0x7b   :  { %779 = vmatprep.subr.bf16.mxu1 %v778_v4  ;;  %v802_v30 = vpack.c.bf16 %v432_v28, %v431_v27 }
  0x7c   :  { %773 = vmatpush3.bf16.msra.mxu0 %v770_v49 }
  0x7d   :  { %775 = vmatprep.subr.bf16.mxu0 %v774_v1 }
  0x80   :  { %777 = vmatpush3.bf16.msra.mxu0 %v774_v1 }
 0x133   :  { %v602_v51 = vpop.f32.mrb[0].mxu0 }
 0x134   :  { %v194_v52 = vadd.f32 %v602_v51, %v527_v50  ;;  %v188_v53 = vpop.f32.mrb[1].mxu0 }
 0x135   :  { %v189_v54 = vadd.f32 %v527_v50, %v188_v53 }
 0x136   :  { %v532_v55 = vmul.f32 -1.442695, %v194_v52 }
 0x137   :  { %v531_v56 = vmul.f32 -1.442695, %v189_v54 }
 0x138   :  { %818 = vpow2.f32 %v532_v55 }
 0x139   :  { %820 = vpow2.f32 %v531_v56 }
 0x142   :  { %v819_v57 = vpop.eup %818 }
 0x143   :  { %v821_v58 = vpop.eup %820  ;;  %v204_v59 = vadd.f32 1.0, %v819_v57 }
 0x144   :  { %v203_v60 = vadd.f32 1.0, %v821_v58 }
 0x146   :  { %822 = vrcp.f32 %v203_v60 }
 0x147   :  { %824 = vrcp.f32 %v204_v59 }
 0x150   :  { %v823_v61 = vpop.eup %822 }
 0x151   :  { %v825_v62 = vpop.eup %824  ;;  %635 = vmatprep.mubr.f32.mxu1 %v823_v61 }
 0x152   :  { %636 = vmatmul.mubr.f32.vlgmr.msra.gmra.mrb[0].mxu1 %v825_v62 }
 0x153   :  { %781 = vmatpush3.bf16.msra.mxu1 %v778_v4 }
 0x154   :  { %783 = vmatprep.subr.bf16.mxu1 %v782_v14 }
 0x157   :  { %785 = vmatpush3.bf16.msra.mxu1 %v782_v14 }
 0x158   :  { %787 = vmatprep.subr.bf16.mxu1 %v786_v17 }
 0x15b   :  { %789 = vmatpush3.bf16.msra.mxu1 %v786_v17 }
 0x15c   :  { %791 = vmatprep.subr.bf16.mxu1 %v790_v20 }
 0x15f   :  { %793 = vmatpush3.bf16.msra.mxu1 %v790_v20 }
 0x160   :  { %795 = vmatprep.subr.bf16.mxu1 %v794_v23 }
 0x163   :  { %797 = vmatpush3.bf16.msra.mxu1 %v794_v23 }
 0x164   :  { %799 = vmatprep.subr.bf16.mxu1 %v798_v26 }
 0x167   :  { %801 = vmatpush3.bf16.msra.mxu1 %v798_v26 }
 0x168   :  { %803 = vmatprep.subr.bf16.mxu1 %v802_v30 }
 0x16b   :  { %805 = vmatpush3.bf16.msra.mxu1 %v802_v30 }
 0x16c   :  { %807 = vmatprep.subr.bf16.mxu1 %v806_v32 }
 0x16f   :  { %809 = vmatpush3.bf16.msra.mxu1 %v806_v32 }
 0x225   :  { %v637_v6 = vpop.f32.mrb[0].mxu1 }
 0x226   :  { %v304_v7 = vadd.f32 %v637_v6, %v533_v5  ;;  %v298_v8 = vpop.f32.mrb[1].mxu1 }
 0x227   :  { %v299_v9 = vadd.f32 %v533_v5, %v298_v8 }
 0x228   :  { %v308_v11 = vmax.f32 %v304_v7, 0.0 }
 0x229   :  { %v307_v10 = vmax.f32 %v299_v9, 0.0 }
 0x22b   :  { %670 = vmatprep.mubr.f32.mxu0 %v307_v10 }
 0x22c   :  { %671 = vmatmul.mubr.f32.vlgmr.msra.gmra.mrb[2].mxu0 %v308_v11 }
 0x2ff   :  { %v672_v34 = vpop.f32.mrb[2].mxu0 }
 0x300   :  { %v404_v35 = vadd.f32 %v672_v34, %v534_v33  ;;  %v398_v36 = vpop.f32.mrb[3].mxu0 }
 0x301   :  { %v399_v37 = vadd.f32 %v534_v33, %v398_v36 }
 0x302   :  { %v536_v38 = vmul.f32 -1.442695, %v404_v35 }
 0x303   :  { %v535_v39 = vmul.f32 -1.442695, %v399_v37 }
 0x304   :  { %826 = vpow2.f32 %v536_v38 }
 0x305   :  { %828 = vpow2.f32 %v535_v39 }
 0x30e   :  { %v827_v40 = vpop.eup %826 }
 0x30f   :  { %v829_v41 = vpop.eup %828  ;;  %v414_v42 = vadd.f32 1.0, %v827_v40 }
 0x310   :  { %v413_v43 = vadd.f32 1.0, %v829_v41 }
 0x312   :  { %830 = vrcp.f32 %v413_v43 }
 0x313   :  { %832 = vrcp.f32 %v414_v42 }
 0x31c   :  { %v831_v44 = vpop.eup %830 }
 0x31d   :  { %v833_v45 = vpop.eup %832  ;;  %705 = vmatprep.mubr.f32.mxu1 %v831_v44 }
 0x31e   :  { %706 = vmatmul.mubr.f32.vlgmr.msra.gmra.mrb[2].mxu1 %v833_v45 }
 0x3f1   :  { %v707_v47 = vpop.f32.mrb[2].mxu1 }
 0x3f2   :  { %v514_v48 = vadd.f32 %v707_v47, %v537_v46  ;;  %v508_v49 = vpop.f32.mrb[3].mxu1 }
 0x3f3   :  { %v509_v50 = vadd.f32 %v537_v46, %v508_v49 }
 0x3f4   :  { %519 = vst.msk [vmem:[%s1126_s9 + $0x8] sm:$0xff] %vm517_vm4, %v514_v48 }
 0x3f5   :  { %518 = vst.msk [vmem:[%s1126_s9] sm:$0xff] %vm517_vm4, %v509_v50 }
 0x3f6   :  { %524 = vsyncpa [#allocation3], 1 }
 0x3f7   :  { %525 = vsyncpa [#allocation5], 1 }
 0x3f8   :  { %526 = vsyncpa [#allocation8], 1 }

</bundles_post_ra>
